<compile_context>
chip_gen: v7x
topology: tpu7x:2x2x1
jax: 0.10.0
libtpu: 0.0.40
codegen_flags: <defaults>
</compile_context>

<pallas_src>
import jax
import jax.numpy as jnp
from jax.experimental import pallas as pl
from jax.experimental.pallas import tpu as pltpu


def _round_up(a, m):
    return (a + m - 1) // m * m


def _mlp_kernel(x_ref, w1_ref, b1_ref, w2_ref, b2_ref, o_ref):
    # Whole hot path (both layers + bias + ReLU) fused in one kernel invocation.
    x = x_ref[...]                       # (tile, in_dim)  f32
    w1 = w1_ref[...]                     # (in_dim, hid_p) f32
    in_dim = x.shape[1]

    # Layer 1: tiny K -> unrolled broadcast multiply-adds on the VPU (keeps the MXU
    # free and avoids padding K to 128/256 inside a matmul).  Exact f32 math.
    h = x[:, 0:1] * w1[0:1, :] + b1_ref[...]
    for k in range(1, in_dim):           # static unroll (in_dim is small, e.g. 3)
        h = h + x[:, k:k + 1] * w1[k:k + 1, :]
    h = jnp.maximum(h, 0.0)              # (tile, hid_p) f32

    # Layer 2: MXU matmul, bf16 operands with f32 accumulation.
    y = jnp.dot(h.astype(jnp.bfloat16),
                w2_ref[...].astype(jnp.bfloat16),
                preferred_element_type=jnp.float32) + b2_ref[...]
    o_ref[...] = jnp.maximum(y, 0.0).astype(o_ref.dtype)


def product_encoder_forward(prod_features, w1, b1, w2, b2, *, tile_n=512):
    """prod_features: [N, input_dim] float32.
    w1: [input_dim, hidden_dim], b1: [hidden_dim] or [1, hidden_dim]
    w2: [hidden_dim, embed_dim], b2: [embed_dim]  or [1, embed_dim]
    returns [N, embed_dim] float32.
    """
    N, in_dim = prod_features.shape
    hid = w1.shape[1]
    emb = w2.shape[1]

    # ---- lane-dense padding of the feature dims (multiples of 128 lanes) ----
    hid_p = _round_up(hid, 128)
    emb_p = _round_up(emb, 128)
    w1p = jnp.zeros((in_dim, hid_p), jnp.float32).at[:, :hid].set(w1)
    b1p = jnp.zeros((1, hid_p), jnp.float32).at[:, :hid].set(jnp.reshape(b1, (1, hid)))
    w2p = jnp.zeros((hid_p, emb_p), jnp.float32).at[:hid, :emb].set(w2)
    b2p = jnp.zeros((1, emb_p), jnp.float32).at[:, :emb].set(jnp.reshape(b2, (1, emb)))

    # ---- batch tiling: big tiles, pad N so any batch size works -------------
    tile = _round_up(min(tile_n, _round_up(N, 8)), 8)
    n_pad = _round_up(N, tile)
    xp = prod_features
    if n_pad != N:
        xp = jnp.zeros((n_pad, in_dim), prod_features.dtype).at[:N].set(prod_features)

    grid = (n_pad // tile,)
    flops = 2 * n_pad * (in_dim * hid_p + hid_p * emb_p)
    bytes_accessed = 4 * (n_pad * (in_dim + emb_p)
                          + in_dim * hid_p + hid_p * emb_p + hid_p + emb_p)

    out = pl.pallas_call(
        _mlp_kernel,
        out_shape=jax.ShapeDtypeStruct((n_pad, emb_p), jnp.float32),
        grid_spec=pltpu.PrefetchScalarGridSpec(
            num_scalar_prefetch=0,
            grid=grid,
            in_specs=[
                # batch tile of the input rows (in_dim == full dim, so no (8,128) issue)
                pl.BlockSpec((tile, in_dim), lambda i: (i, 0)),
                # small weight / bias tensors, resident across all grid steps
                pl.BlockSpec((in_dim, hid_p), lambda i: (0, 0)),
                pl.BlockSpec((1, hid_p), lambda i: (0, 0)),
                pl.BlockSpec((hid_p, emb_p), lambda i: (0, 0)),
                pl.BlockSpec((1, emb_p), lambda i: (0, 0)),
            ],
            out_specs=pl.BlockSpec((tile, emb_p), lambda i: (i, 0)),
        ),
        compiler_params=pltpu.CompilerParams(
            dimension_semantics=("parallel",),
        ),
        cost_estimate=pl.CostEstimate(
            flops=flops, transcendentals=0, bytes_accessed=bytes_accessed),
    )(xp, w1p, b1p, w2p, b2p)

    # Slice away batch padding and the lane padding of the embedding dim.
    return out[:N, :emb]


def init_params(key, input_dim=3, hidden_dim=64, embed_dim=32):
    """Deterministic init matching nn.Linear shapes (weights stored transposed)."""
    k1, k2, k3, k4 = jax.random.split(key, 4)
    lim1 = 1.0 / (input_dim ** 0.5)
    lim2 = 1.0 / (hidden_dim ** 0.5)
    w1 = jax.random.uniform(k1, (input_dim, hidden_dim), jnp.float32, -lim1, lim1)
    b1 = jax.random.uniform(k2, (1, hidden_dim), jnp.float32, -lim1, lim1)
    w2 = jax.random.uniform(k3, (hidden_dim, embed_dim), jnp.float32, -lim2, lim2)
    b2 = jax.random.uniform(k4, (1, embed_dim), jnp.float32, -lim2, lim2)
    return w1, b1, w2, b2


def _ref(x, w1, b1, w2, b2):
    return jnp.maximum(jnp.maximum(x @ w1 + b1, 0.0) @ w2 + b2, 0.0)


if __name__ == "__main__":
    key = jax.random.PRNGKey(0)
    kx, kp, kx2 = jax.random.split(key, 3)

    input_dim, hidden_dim, embed_dim = 3, 64, 32
    w1, b1, w2, b2 = init_params(kp, input_dim, hidden_dim, embed_dim)

    # Case 1: small batch (single grid step).
    x = jax.random.normal(kx, (8, input_dim), jnp.float32)
    out = jax.block_until_ready(product_encoder_forward(x, w1, b1, w2, b2))
    assert out.shape == (8, embed_dim)
    # bf16 MXU operands (f32 accumulation) -> compare with a modest tolerance.
    assert jnp.allclose(out, _ref(x, w1, b1, w2, b2), atol=2e-2, rtol=2e-2)

    # Case 2: batch not divisible by the tile -> exercises padding + multi-step grid.
    x2 = jax.random.normal(kx2, (200, input_dim), jnp.float32)
    out2 = jax.block_until_ready(
        product_encoder_forward(x2, w1, b1, w2, b2, tile_n=64))
    assert out2.shape == (200, embed_dim)
    assert jnp.allclose(out2, _ref(x2, w1, b1, w2, b2), atol=2e-2, rtol=2e-2)

    print("KERNEL_OK")
</pallas_src>

<mosaic_0001>
module attributes {stable_mosaic.version = 11 : i64} {
  func.func @_mlp_kernel(%arg0: i32, %arg1: memref<8x3xf32, #tpu.memory_space<vmem>>, %arg2: memref<3x128xf32, #tpu.memory_space<vmem>>, %arg3: memref<1x128xf32, #tpu.memory_space<vmem>>, %arg4: memref<128x128xf32, #tpu.memory_space<vmem>>, %arg5: memref<1x128xf32, #tpu.memory_space<vmem>>, %arg6: memref<8x128xf32, #tpu.memory_space<vmem>>) attributes {dimension_semantics = [#tpu.dimension_semantics<parallel>], iteration_bounds = array<i64: 1>, scalar_prefetch = 0 : i64, scratch_operands = 0 : i64, tpu.core_type = #tpu.core_type<tc>, window_params = [{transform_indices = @transform_0, window_bounds = array<i64: 8, 3>}, {pipeline_mode = #tpu.pipeline_mode<synchronous>, transform_indices = @transform_1, window_bounds = array<i64: 3, 128>}, {pipeline_mode = #tpu.pipeline_mode<synchronous>, transform_indices = @transform_2, window_bounds = array<i64: 1, 128>}, {pipeline_mode = #tpu.pipeline_mode<synchronous>, transform_indices = @transform_3, window_bounds = array<i64: 128, 128>}, {pipeline_mode = #tpu.pipeline_mode<synchronous>, transform_indices = @transform_4, window_bounds = array<i64: 1, 128>}, {transform_indices = @transform_5, window_bounds = array<i64: 8, 128>}]} {
    %c0 = arith.constant 0 : index
    %c0_0 = arith.constant 0 : index
    %0 = vector.load %arg1[%c0, %c0_0] : memref<8x3xf32, #tpu.memory_space<vmem>>, vector<8x3xf32>
    %c0_1 = arith.constant 0 : index
    %c0_2 = arith.constant 0 : index
    %1 = vector.load %arg2[%c0_1, %c0_2] : memref<3x128xf32, #tpu.memory_space<vmem>>, vector<3x128xf32>
    %2 = vector.extract_strided_slice %0 {offsets = [0, 0], sizes = [8, 1], strides = [1, 1]} : vector<8x3xf32> to vector<8x1xf32>
    %3 = vector.extract_strided_slice %1 {offsets = [0, 0], sizes = [1, 128], strides = [1, 1]} : vector<3x128xf32> to vector<1x128xf32>
    %4 = vector.broadcast %2 : vector<8x1xf32> to vector<8x128xf32>
    %5 = vector.broadcast %3 : vector<1x128xf32> to vector<8x128xf32>
    %6 = arith.mulf %4, %5 : vector<8x128xf32>
    %c0_3 = arith.constant 0 : index
    %c0_4 = arith.constant 0 : index
    %7 = vector.load %arg3[%c0_3, %c0_4] : memref<1x128xf32, #tpu.memory_space<vmem>>, vector<1x128xf32>
    %8 = vector.broadcast %7 : vector<1x128xf32> to vector<8x128xf32>
    %9 = arith.addf %6, %8 : vector<8x128xf32>
    %10 = vector.extract_strided_slice %0 {offsets = [0, 1], sizes = [8, 1], strides = [1, 1]} : vector<8x3xf32> to vector<8x1xf32>
    %11 = vector.extract_strided_slice %1 {offsets = [1, 0], sizes = [1, 128], strides = [1, 1]} : vector<3x128xf32> to vector<1x128xf32>
    %12 = vector.broadcast %10 : vector<8x1xf32> to vector<8x128xf32>
    %13 = vector.broadcast %11 : vector<1x128xf32> to vector<8x128xf32>
    %14 = arith.mulf %12, %13 : vector<8x128xf32>
    %15 = arith.addf %9, %14 : vector<8x128xf32>
    %16 = vector.extract_strided_slice %0 {offsets = [0, 2], sizes = [8, 1], strides = [1, 1]} : vector<8x3xf32> to vector<8x1xf32>
    %17 = vector.extract_strided_slice %1 {offsets = [2, 0], sizes = [1, 128], strides = [1, 1]} : vector<3x128xf32> to vector<1x128xf32>
    %18 = vector.broadcast %16 : vector<8x1xf32> to vector<8x128xf32>
    %19 = vector.broadcast %17 : vector<1x128xf32> to vector<8x128xf32>
    %20 = arith.mulf %18, %19 : vector<8x128xf32>
    %21 = arith.addf %15, %20 : vector<8x128xf32>
    %cst = arith.constant 0.000000e+00 : f32
    %22 = vector.broadcast %cst : f32 to vector<8x128xf32>
    %23 = arith.maximumf %21, %22 : vector<8x128xf32>
    %24 = arith.truncf %23 : vector<8x128xf32> to vector<8x128xbf16>
    %c0_5 = arith.constant 0 : index
    %c0_6 = arith.constant 0 : index
    %25 = vector.load %arg4[%c0_5, %c0_6] : memref<128x128xf32, #tpu.memory_space<vmem>>, vector<128x128xf32>
    %26 = arith.truncf %25 : vector<128x128xf32> to vector<128x128xbf16>
    %cst_7 = arith.constant dense<0.000000e+00> : vector<8x128xf32>
    %27 = tpu.matmul %24, %26, %cst_7 {dimension_numbers = #tpu.dot_dimension_numbers<[1], [0], [0], [1], [0, 0, 1, 1], [], []>} : vector<8x128xbf16>, vector<128x128xbf16>, vector<8x128xf32> -> vector<8x128xf32>
    %c0_8 = arith.constant 0 : index
    %c0_9 = arith.constant 0 : index
    %28 = vector.load %arg5[%c0_8, %c0_9] : memref<1x128xf32, #tpu.memory_space<vmem>>, vector<1x128xf32>
    %29 = vector.broadcast %28 : vector<1x128xf32> to vector<8x128xf32>
    %30 = arith.addf %27, %29 : vector<8x128xf32>
    %cst_10 = arith.constant 0.000000e+00 : f32
    %31 = vector.broadcast %cst_10 : f32 to vector<8x128xf32>
    %32 = arith.maximumf %30, %31 : vector<8x128xf32>
    %c0_11 = arith.constant 0 : index
    %c0_12 = arith.constant 0 : index
    %33 = vector.load %arg6[%c0_11, %c0_12] : memref<8x128xf32, #tpu.memory_space<vmem>>, vector<8x128xf32>
    tpu.vector_store %arg6[%c0_11, %c0_12], %32 {strides = array<i32>} : memref<8x128xf32, #tpu.memory_space<vmem>>, vector<8x128xf32>,
    return
  }
  func.func @transform_0(%arg0: i32) -> (i32, i32) {
    %c0_i32 = arith.constant 0 : i32
    %c0_i32_0 = arith.constant 0 : i32
    return %arg0, %c0_i32 : i32, i32
  }
  func.func @transform_1(%arg0: i32) -> (i32, i32) {
    %c0_i32 = arith.constant 0 : i32
    %c0_i32_0 = arith.constant 0 : i32
    %c0_i32_1 = arith.constant 0 : i32
    return %c0_i32, %c0_i32_0 : i32, i32
  }
  func.func @transform_2(%arg0: i32) -> (i32, i32) {
    %c0_i32 = arith.constant 0 : i32
    %c0_i32_0 = arith.constant 0 : i32
    %c0_i32_1 = arith.constant 0 : i32
    return %c0_i32, %c0_i32_0 : i32, i32
  }
  func.func @transform_3(%arg0: i32) -> (i32, i32) {
    %c0_i32 = arith.constant 0 : i32
    %c0_i32_0 = arith.constant 0 : i32
    %c0_i32_1 = arith.constant 0 : i32
    return %c0_i32, %c0_i32_0 : i32, i32
  }
  func.func @transform_4(%arg0: i32) -> (i32, i32) {
    %c0_i32 = arith.constant 0 : i32
    %c0_i32_0 = arith.constant 0 : i32
    %c0_i32_1 = arith.constant 0 : i32
    return %c0_i32, %c0_i32_0 : i32, i32
  }
  func.func @transform_5(%arg0: i32) -> (i32, i32) {
    %c0_i32 = arith.constant 0 : i32
    %c0_i32_0 = arith.constant 0 : i32
    return %arg0, %c0_i32 : i32, i32
  }
}

</mosaic_0001>

<bundles_post_ra>
// kernel: tpu_custom_call.1
= control target key start
LH: loop header
LB: loop body
LE: loop exit
PB: predicated region body
PF: predicated region fallthrough
CT: control target
= control target key end

     0   :  { %10 = vsyncpa [#allocation3], 0  ;;  %s333_s0 = inlined_call_operand.vmem [shape: f32[8,3], index: 0, kind: input, shape index: {}]   ;;  %s334_s1 = inlined_call_operand.vmem [shape: f32[3,128], index: 1, kind: input, shape index: {}]   ;;  %s335_s2 = inlined_call_operand.vmem [shape: f32[1,128], index: 2, kind: input, shape index: {}]   ;;  %s336_s3 = inlined_call_operand.hbm [shape: f32[128,128], index: 3, kind: input, shape index: {}]   ;;  %s337_s4 = inlined_call_operand.vmem [shape: f32[1,128], index: 4, kind: input, shape index: {}]   ;;  %s338_s5 = inlined_call_operand.hbm [shape: f32[8,128], index: 5, kind: output, shape index: {}]  }
   0x1   :  { %11 = vsyncpa [#allocation4], 0  ;;  %s258_s18 = smov [#allocation2]   ;;  %s210_s22 = scalar_lea.hbm %s336_s3, 2048 }
   0x2   :  { %s23_s19 = sshll.u32 %s258_s18, 4  ;;  %p211_p0 = scmp.ne.s32.totalorder %s336_s3, %s210_s22  ;;  %s24_s19 = int_to_ptr.vmem [resolvable:$true] %s23_s19 }
   0x3   :  { %p214_p1 = scmp.lt.u32.totalorder %s210_s22, %s336_s3 }
   0x5   :  { %p216_p2 = pnand %p214_p1, %p211_p0 }
   0x7   :  { %219 = shalt.err (!%p216_p2)
}
   0x8   :  { %s220_s27 = scalar_lea.vmem %s24_s19, 2048  ;;  %p225_p4 = scmp.lt.s32.totalorder %s24_s19, %s24_s19 }
   0x9   :  { %p221_p3 = scmp.ne.s32.totalorder %s24_s19, %s220_s27  ;;  %p226_p5 = scmp.lt.s32.totalorder %s220_s27, %s220_s27 }
   0xb   :  { %p227_p6 = por %p226_p5, %p225_p4 }
   0xd   :  { %p228_p7 = pnand %p227_p6, %p221_p3 }
   0xf   :  { %231 = shalt.err (!%p228_p7)
}
  0x10   :  { %s259_s28 = smov 128   ;;  %s260_s29 = smov 8  }
  0x11   :  { %29 = dma.hbm_to_vmem [thread:$0]  %s336_s3, 2048, %s24_s19, [#allocation3], %s259_s28, %s259_s28, %s260_s29  }
  0x12   :  { %254 = dma.done.wait [#allocation3], 2048  }
  0x13   :  { %255 = vsyncadd [#allocation3], 4294965248  ;;  %v261_v0 = vmov 0   ;;  %v262_v1 = vmov 2   ;;  %v263_v2 = vmov 0.0   ;;  %v36_v3 = vld [vmem:[%s333_s0] sm:$0xff]  ;;  %v43_v29 = vlaneseq }
  0x14   :  { %206 = vset.pattern.permute.xlu0 %v261_v0  ;;  %208 = vset.pattern.permute.xlu1 %v262_v1  ;;  %v78_v4 = vld [vmem:[#allocation2] sm:$0xff]  ;;  %v79_v5 = vld [vmem:[#allocation2 + $0x8] sm:$0xff]  ;;  %v80_v7 = vld [vmem:[#allocation2 + $0x10] sm:$0xff]  ;;  %v264_v12 = vmov 1   ;;  %vm265_vm0 = vmmov 0   ;;  %s266_s12 = smov [#allocation5]  }
  0x15   :  { %177 = vmatprep.subr.bf16.mxu0 %v263_v2  ;;  %40 = vperm.xlu0 %206, %v36_v3   ;;  %v94_v6 = vpack.c.bf16 %v79_v5, %v78_v4  ;;  %v81_v8 = vld [vmem:[#allocation2 + $0x18] sm:$0xff]  ;;  %v82_v10 = vld [vmem:[#allocation2 + $0x20] sm:$0xff]  ;;  %v83_v11 = vld [vmem:[#allocation2 + $0x28] sm:$0xff]  ;;  %v44_v30 = vshrl.u32 %v43_v29, 7  ;;  %s157_s13 = sshll.u32 %s266_s12, 4  ;;  %s158_s13 = int_to_ptr.vmem [resolvable:$true] %s157_s13 }
  0x16   :  { %67 = vperm.xlu1 %208, %v36_v3   ;;  %v95_v9 = vpack.c.bf16 %v81_v8, %v80_v7  ;;  %v96_v13 = vpack.c.bf16 %v83_v11, %v82_v10  ;;  %v84_v14 = vld [vmem:[#allocation2 + $0x30] sm:$0xff]  ;;  %v85_v15 = vld [vmem:[#allocation2 + $0x38] sm:$0xff]  ;;  %v86_v17 = vld [vmem:[#allocation2 + $0x40] sm:$0xff]  ;;  %193 = vmatprep.mubr.msk.bf16.mxu0 %vm265_vm0, %v263_v2  ;;  %p237_p9 = scmp.lt.s32.totalorder %s158_s13, %s158_s13 }
  0x17   :  { %178 = vmatpush3.bf16.msra.mxu0 %v94_v6  ;;  %v97_v16 = vpack.c.bf16 %v85_v15, %v84_v14  ;;  %v87_v18 = vld [vmem:[#allocation2 + $0x48] sm:$0xff]  ;;  %v88_v20 = vld [vmem:[#allocation2 + $0x50] sm:$0xff]  ;;  %v89_v21 = vld [vmem:[#allocation2 + $0x58] sm:$0xff]  ;;  %v45_v31 = vsub.s32 0, %v44_v30  ;;  %v62_v34 = vsub.s32 1, %v44_v30  ;;  %v72_v35 = vsub.s32 2, %v44_v30 }
  0x18   :  { %179 = vmatprep.subr.bf16.mxu0 %v263_v2  ;;  %v98_v19 = vpack.c.bf16 %v87_v18, %v86_v17  ;;  %v99_v22 = vpack.c.bf16 %v89_v21, %v88_v20  ;;  %v90_v23 = vld [vmem:[#allocation2 + $0x60] sm:$0xff]  ;;  %v91_v24 = vld [vmem:[#allocation2 + $0x68] sm:$0xff]  ;;  %v92_v26 = vld [vmem:[#allocation2 + $0x70] sm:$0xff] }
  0x19   :  { %207 = vset.pattern.permute.xlu0 %v264_v12  ;;  %v100_v25 = vpack.c.bf16 %v91_v24, %v90_v23  ;;  %v93_v27 = vld [vmem:[#allocation2 + $0x78] sm:$0xff]  ;;  %v37_v32 = vld [vmem:[%s334_s1] sm:$0x7] }
  0x1a   :  { %57 = vperm.xlu0 %207, %v36_v3   ;;  %v101_v28 = vpack.c.bf16 %v93_v27, %v92_v26  ;;  %v46_v33 = vrot.slane %v37_v32, %v45_v31  ;;  %v63_v38 = vrot.slane %v37_v32, %v62_v34  ;;  %v73_v39 = vrot.slane %v37_v32, %v72_v35  ;;  %v166_v40 = vld [vmem:[%s335_s2] ss:$0 sm:$0xff]  ;;  %s232_s2 = scalar_lea.vmem %s158_s13, 128 }
  0x1b   :  { %180 = vmatpush3.bf16.msra.mxu0 %v95_v9  ;;  %v167_v50 = vld [vmem:[%s337_s4] ss:$0 sm:$0xff]  ;;  %p233_p8 = scmp.ne.s32.totalorder %s158_s13, %s232_s2  ;;  %p238_p10 = scmp.lt.s32.totalorder %s232_s2, %s232_s2 }
  0x1c   :  { %181 = vmatprep.subr.bf16.mxu0 %v263_v2 }
  0x1d   :  { %p239_p11 = por %p238_p10, %p237_p9 }
  0x1e   :  { %209 = vset.pattern.permute.xlu0 %v262_v1 }
  0x1f   :  { %182 = vmatpush3.bf16.msra.mxu0 %v96_v13  ;;  %p240_p12 = pnand %p239_p11, %p233_p8 }
  0x20   :  { %183 = vmatprep.subr.bf16.mxu0 %v263_v2 }
  0x23   :  { %184 = vmatpush3.bf16.msra.mxu0 %v97_v16 }
  0x24   :  { %185 = vmatprep.subr.bf16.mxu0 %v263_v2 }
  0x27   :  { %186 = vmatpush3.bf16.msra.mxu0 %v98_v19 }
  0x28   :  { %187 = vmatprep.subr.bf16.mxu0 %v263_v2 }
  0x2b   :  { %188 = vmatpush3.bf16.msra.mxu0 %v99_v22 }
  0x2c   :  { %189 = vmatprep.subr.bf16.mxu0 %v263_v2 }
  0x2f   :  { %190 = vmatpush3.bf16.msra.mxu0 %v100_v25 }
  0x30   :  { %191 = vmatprep.subr.bf16.mxu0 %v263_v2 }
  0x33   :  { %192 = vmatpush3.bf16.msra.mxu0 %v101_v28 }
  0x94   :  { %v41_v36 = vpop.permute.xlu0 %40 }
  0x95   :  { %v47_v37 = vmul.f32 %v46_v33, %v41_v36  ;;  %v68_v41 = vpop.permute.xlu1 %67 }
  0x96   :  { %v74_v45 = vmul.f32 %v73_v39, %v68_v41 }
  0x97   :  { %v55_v43 = vadd.f32 %v166_v40, %v47_v37 }
  0x99   :  { %v58_v42 = vpop.permute.xlu0 %57 }
  0x9a   :  { %v64_v44 = vmul.f32 %v63_v38, %v58_v42 }
  0x9c   :  { %v65_v46 = vadd.f32 %v64_v44, %v55_v43 }
  0x9e   :  { %v75_v47 = vadd.f32 %v74_v45, %v65_v46 }
  0xa0   :  { %v76_v48 = vmax.f32 %v75_v47, 0.0 }
  0xa2   :  { %v77_v49 = vpack.c.bf16 %v76_v48, %v76_v48 }
  0xa4   :  { %194 = vmatmul.mubr.bf16.vlgmr.msra.gmra.mrb[0].mxu0 %v77_v49 }
 0x177   :  { %v143_v51 = vpop.f32.mrb[0].mxu0 }
 0x178   :  { %v144_v52 = vadd.f32 %v167_v50, %v143_v51  ;;  %v195_v53 = vpop.f32.mrb[1].mxu0 }
 0x179   :  { %v146_v54 = vpop.f32.mrb[2].mxu0 }
 0x17a   :  { %v149_v55 = vmax.f32 %v144_v52, 0.0  ;;  %v196_v56 = vpop.f32.mrb[3].mxu0 }
 0x17c   :  { %150 = vst [vmem:[#allocation5] sm:$0xff] %v149_v55 }
 0x17d   :  { %243 = shalt.err (!%p240_p12)
}
 0x17e   :  { %s244_s4 = scalar_lea.hbm %s338_s5, 128 }
 0x17f   :  { %p245_p13 = scmp.ne.s32.totalorder %s338_s5, %s244_s4  ;;  %p248_p0 = scmp.lt.u32.totalorder %s244_s4, %s338_s5 }
 0x181   :  { %p250_p1 = pnand %p248_p0, %p245_p13 }
 0x183   :  { %253 = shalt.err (!%p250_p1)
}
 0x184   :  { %160 = dma.vmem_to_hbm [thread:$0]  %s158_s13, 128, %s338_s5, [#allocation4]  }
 0x185   :  { %256 = dma.done.wait [#allocation4], 128  }
 0x186   :  { %257 = vsyncadd [#allocation4], 4294967168 }
 0x187   :  { %164 = vsyncpa [#allocation3], 1 }
 0x188   :  { %165 = vsyncpa [#allocation4], 1 }

</bundles_post_ra>
